<compile_context>
chip_gen: v7x
topology: tpu7x:2x2x1
jax: 0.10.0
libtpu: 0.0.40
codegen_flags: <defaults>
</compile_context>

<pallas_src>
import jax
import jax.numpy as jnp
from jax.experimental import pallas as pl
from jax.experimental.pallas import tpu as pltpu


def decoder_kernel(z_ref, wih_ref, whh_ref, b_ref, wout_ref, bout_ref,
                   out_ref, h_all):
    """One-shot LSTM decoder.

    z_ref    : (B, L)        latent input
    wih_ref  : (L, 4H)       input->gates weight (transposed PyTorch weight_ih_l0)
    whh_ref  : (H, 4H)       hidden->gates weight (transposed weight_hh_l0)
    b_ref    : (1, 4H)       bias_ih_l0 + bias_hh_l0
    wout_ref : (H, O)        fc_out weight (transposed)
    bout_ref : (1, O)        fc_out bias
    out_ref  : (B, T, O)     output (batch-major; no wrapper transpose needed)
    h_all    : (B*T, H) VMEM scratch of hidden states, row = b*T + t
    """
    B = z_ref.shape[0]
    H = whh_ref.shape[0]
    T = out_ref.shape[1]
    O = wout_ref.shape[1]

    # Hoist weight loads and the time-invariant input->gate contribution.
    w_hh = whh_ref[...]                                          # (H, 4H)
    x_gates = (jnp.dot(z_ref[...], wih_ref[...],
                       preferred_element_type=jnp.float32)
               + b_ref[...])                                     # (B, 4H)

    h = jnp.zeros((B, H), jnp.float32)
    c = jnp.zeros((B, H), jnp.float32)

    # Fully unrolled recurrence (T is small and static). A static Python loop
    # keeps every scratch-store offset compile-time constant and carries h/c
    # in vregs across iterations (live set is only a handful of vregs here).
    for t in range(T):
        gates = x_gates + jnp.dot(h, w_hh,
                                  preferred_element_type=jnp.float32)  # (B, 4H)
        # PyTorch gate order: i, f, g, o
        i_g = jax.nn.sigmoid(gates[:, 0 * H:1 * H])
        f_g = jax.nn.sigmoid(gates[:, 1 * H:2 * H])
        g_g = jnp.tanh(gates[:, 2 * H:3 * H])
        o_g = jax.nn.sigmoid(gates[:, 3 * H:4 * H])

        c = f_g * c + i_g * g_g
        h = o_g * jnp.tanh(c)

        # Scatter this step's hidden rows into batch-major order (row = b*T+t)
        # so the post-loop projection/store needs no transpose or relayout.
        for b in range(B):
            h_all[pl.ds(b * T + t, 1), :] = h[b:b + 1, :]

    # One wide output projection + one full-ref store after the recurrence.
    out = (jnp.dot(h_all[...], wout_ref[...],
                   preferred_element_type=jnp.float32)
           + bout_ref[...])                                      # (B*T, O)
    out_ref[...] = out.reshape(B, T, O).astype(out_ref.dtype)


def decoder_forward(z, params, seq_length):
    """z: (B, latent_dim) -> (B, seq_length, output_dim)."""
    B, _ = z.shape
    H = params["W_hh_T"].shape[0]
    O = params["W_out_T"].shape[1]

    return pl.pallas_call(
        decoder_kernel,
        out_shape=jax.ShapeDtypeStruct((B, seq_length, O), jnp.float32),
        in_specs=[pl.BlockSpec(memory_space=pltpu.MemorySpace.VMEM)] * 6,
        out_specs=pl.BlockSpec(memory_space=pltpu.MemorySpace.VMEM),
        scratch_shapes=[
            pltpu.VMEM((B * seq_length, H), jnp.float32),   # stacked h_t
        ],
    )(z, params["W_ih_T"], params["W_hh_T"], params["b"],
      params["W_out_T"], params["b_out"])


def init_params(key, latent_dim, hidden_dim, output_dim):
    """Deterministic synthetic init mimicking PyTorch's U(-1/sqrt(H), 1/sqrt(H))."""
    k = jax.random.split(key, 6)
    s = 1.0 / jnp.sqrt(hidden_dim)
    w_ih = jax.random.uniform(k[0], (4 * hidden_dim, latent_dim), jnp.float32, -s, s)
    w_hh = jax.random.uniform(k[1], (4 * hidden_dim, hidden_dim), jnp.float32, -s, s)
    b_ih = jax.random.uniform(k[2], (4 * hidden_dim,), jnp.float32, -s, s)
    b_hh = jax.random.uniform(k[3], (4 * hidden_dim,), jnp.float32, -s, s)
    w_out = jax.random.uniform(k[4], (output_dim, hidden_dim), jnp.float32, -s, s)
    b_out = jax.random.uniform(k[5], (output_dim,), jnp.float32, -s, s)
    return {
        "W_ih_T": w_ih.T,                        # (L, 4H)
        "W_hh_T": w_hh.T,                        # (H, 4H)
        "b": (b_ih + b_hh)[None, :],             # (1, 4H)
        "W_out_T": w_out.T,                      # (H, O)
        "b_out": b_out[None, :],                 # (1, O)
    }


def reference_forward(z, params, seq_length):
    """Pure-JAX reference of the PyTorch forward (for correctness check)."""
    H = params["W_hh_T"].shape[0]
    x_gates = z @ params["W_ih_T"] + params["b"][0]
    h = jnp.zeros((z.shape[0], H), jnp.float32)
    c = jnp.zeros_like(h)
    outs = []
    for _ in range(seq_length):
        g = x_gates + h @ params["W_hh_T"]
        i_g = jax.nn.sigmoid(g[:, 0 * H:1 * H])
        f_g = jax.nn.sigmoid(g[:, 1 * H:2 * H])
        g_g = jnp.tanh(g[:, 2 * H:3 * H])
        o_g = jax.nn.sigmoid(g[:, 3 * H:4 * H])
        c = f_g * c + i_g * g_g
        h = o_g * jnp.tanh(c)
        outs.append(h @ params["W_out_T"] + params["b_out"][0])
    return jnp.stack(outs, axis=1)


if __name__ == "__main__":
    latent_dim, hidden_dim, output_dim, seq_length, batch = 16, 32, 2, 8, 2

    key = jax.random.PRNGKey(0)
    k_param, k_z = jax.random.split(key)
    params = init_params(k_param, latent_dim, hidden_dim, output_dim)
    z = jax.random.normal(k_z, (batch, latent_dim), jnp.float32)

    out = decoder_forward(z, params, seq_length)
    out = jax.block_until_ready(out)

    ref = reference_forward(z, params, seq_length)
    assert out.shape == (batch, seq_length, output_dim), out.shape
    assert jnp.allclose(out, ref, atol=1e-5, rtol=1e-5), \
        float(jnp.max(jnp.abs(out - ref)))

    print("KERNEL_OK")
</pallas_src>

<mosaic_0001>
module attributes {stable_mosaic.version = 11 : i64} {
  func.func @decoder_kernel(%arg0: memref<2x16xf32, #tpu.memory_space<vmem>>, %arg1: memref<16x128xf32, #tpu.memory_space<vmem>>, %arg2: memref<32x128xf32, #tpu.memory_space<vmem>>, %arg3: memref<1x128xf32, #tpu.memory_space<vmem>>, %arg4: memref<32x2xf32, #tpu.memory_space<vmem>>, %arg5: memref<1x2xf32, #tpu.memory_space<vmem>>, %arg6: memref<2x8x2xf32, #tpu.memory_space<vmem>>, %arg7: memref<16x32xf32, #tpu.memory_space<vmem>>) attributes {dimension_semantics = [], scalar_prefetch = 0 : i64, scratch_operands = 1 : i64, tpu.core_type = #tpu.core_type<tc>} {
    %c0 = arith.constant 0 : index
    %c0_0 = arith.constant 0 : index
    %0 = vector.load %arg2[%c0, %c0_0] : memref<32x128xf32, #tpu.memory_space<vmem>>, vector<32x128xf32>
    %c0_1 = arith.constant 0 : index
    %c0_2 = arith.constant 0 : index
    %1 = vector.load %arg0[%c0_1, %c0_2] : memref<2x16xf32, #tpu.memory_space<vmem>>, vector<2x16xf32>
    %c0_3 = arith.constant 0 : index
    %c0_4 = arith.constant 0 : index
    %2 = vector.load %arg1[%c0_3, %c0_4] : memref<16x128xf32, #tpu.memory_space<vmem>>, vector<16x128xf32>
    %cst = arith.constant dense<0.000000e+00> : vector<2x128xf32>
    %3 = tpu.matmul %1, %2, %cst {dimension_numbers = #tpu.dot_dimension_numbers<[1], [0], [0], [1], [0, 0, 1, 1], [], []>} : vector<2x16xf32>, vector<16x128xf32>, vector<2x128xf32> -> vector<2x128xf32>
    %c0_5 = arith.constant 0 : index
    %c0_6 = arith.constant 0 : index
    %4 = vector.load %arg3[%c0_5, %c0_6] : memref<1x128xf32, #tpu.memory_space<vmem>>, vector<1x128xf32>
    %5 = vector.broadcast %4 : vector<1x128xf32> to vector<2x128xf32>
    %6 = arith.addf %3, %5 : vector<2x128xf32>
    %cst_7 = arith.constant 0.000000e+00 : f32
    %7 = vector.broadcast %cst_7 : f32 to vector<2x32xf32>
    %cst_8 = arith.constant 0.000000e+00 : f32
    %8 = vector.broadcast %cst_8 : f32 to vector<2x32xf32>
    %cst_9 = arith.constant dense<0.000000e+00> : vector<2x128xf32>
    %9 = tpu.matmul %7, %0, %cst_9 {dimension_numbers = #tpu.dot_dimension_numbers<[1], [0], [0], [1], [0, 0, 1, 1], [], []>} : vector<2x32xf32>, vector<32x128xf32>, vector<2x128xf32> -> vector<2x128xf32>
    %10 = arith.addf %6, %9 : vector<2x128xf32>
    %11 = vector.extract_strided_slice %10 {offsets = [0, 0], sizes = [2, 32], strides = [1, 1]} : vector<2x128xf32> to vector<2x32xf32>
    %12 = arith.negf %11 : vector<2x32xf32>
    %13 = math.exp %12 : vector<2x32xf32>
    %cst_10 = arith.constant 1.000000e+00 : f32
    %14 = vector.broadcast %cst_10 : f32 to vector<2x32xf32>
    %15 = arith.addf %14, %13 : vector<2x32xf32>
    %16 = arith.divf %14, %15 : vector<2x32xf32>
    %17 = vector.extract_strided_slice %10 {offsets = [0, 32], sizes = [2, 32], strides = [1, 1]} : vector<2x128xf32> to vector<2x32xf32>
    %18 = arith.negf %17 : vector<2x32xf32>
    %19 = math.exp %18 : vector<2x32xf32>
    %cst_11 = arith.constant 1.000000e+00 : f32
    %20 = vector.broadcast %cst_11 : f32 to vector<2x32xf32>
    %21 = arith.addf %20, %19 : vector<2x32xf32>
    %22 = arith.divf %20, %21 : vector<2x32xf32>
    %23 = vector.extract_strided_slice %10 {offsets = [0, 64], sizes = [2, 32], strides = [1, 1]} : vector<2x128xf32> to vector<2x32xf32>
    %24 = math.tanh %23 : vector<2x32xf32>
    %25 = vector.extract_strided_slice %10 {offsets = [0, 96], sizes = [2, 32], strides = [1, 1]} : vector<2x128xf32> to vector<2x32xf32>
    %26 = arith.negf %25 : vector<2x32xf32>
    %27 = math.exp %26 : vector<2x32xf32>
    %cst_12 = arith.constant 1.000000e+00 : f32
    %28 = vector.broadcast %cst_12 : f32 to vector<2x32xf32>
    %29 = arith.addf %28, %27 : vector<2x32xf32>
    %30 = arith.divf %28, %29 : vector<2x32xf32>
    %31 = arith.mulf %22, %8 : vector<2x32xf32>
    %32 = arith.mulf %16, %24 : vector<2x32xf32>
    %33 = arith.addf %31, %32 : vector<2x32xf32>
    %34 = math.tanh %33 : vector<2x32xf32>
    %35 = arith.mulf %30, %34 : vector<2x32xf32>
    %36 = vector.extract_strided_slice %35 {offsets = [0, 0], sizes = [1, 32], strides = [1, 1]} : vector<2x32xf32> to vector<1x32xf32>
    %c0_13 = arith.constant 0 : index
    %c0_14 = arith.constant 0 : index
    %37 = vector.load %arg7[%c0_13, %c0_14] : memref<16x32xf32, #tpu.memory_space<vmem>>, vector<1x32xf32>
    tpu.vector_store %arg7[%c0_13, %c0_14], %36 {strides = array<i32>} : memref<16x32xf32, #tpu.memory_space<vmem>>, vector<1x32xf32>,
    %38 = vector.extract_strided_slice %35 {offsets = [1, 0], sizes = [1, 32], strides = [1, 1]} : vector<2x32xf32> to vector<1x32xf32>
    %c8 = arith.constant 8 : index
    %c0_15 = arith.constant 0 : index
    %39 = vector.load %arg7[%c8, %c0_15] : memref<16x32xf32, #tpu.memory_space<vmem>>, vector<1x32xf32>
    tpu.vector_store %arg7[%c8, %c0_15], %38 {strides = array<i32>} : memref<16x32xf32, #tpu.memory_space<vmem>>, vector<1x32xf32>,
    %cst_16 = arith.constant dense<0.000000e+00> : vector<2x128xf32>
    %40 = tpu.matmul %35, %0, %cst_16 {dimension_numbers = #tpu.dot_dimension_numbers<[1], [0], [0], [1], [0, 0, 1, 1], [], []>} : vector<2x32xf32>, vector<32x128xf32>, vector<2x128xf32> -> vector<2x128xf32>
    %41 = arith.addf %6, %40 : vector<2x128xf32>
    %42 = vector.extract_strided_slice %41 {offsets = [0, 0], sizes = [2, 32], strides = [1, 1]} : vector<2x128xf32> to vector<2x32xf32>
    %43 = arith.negf %42 : vector<2x32xf32>
    %44 = math.exp %43 : vector<2x32xf32>
    %cst_17 = arith.constant 1.000000e+00 : f32
    %45 = vector.broadcast %cst_17 : f32 to vector<2x32xf32>
    %46 = arith.addf %45, %44 : vector<2x32xf32>
    %47 = arith.divf %45, %46 : vector<2x32xf32>
    %48 = vector.extract_strided_slice %41 {offsets = [0, 32], sizes = [2, 32], strides = [1, 1]} : vector<2x128xf32> to vector<2x32xf32>
    %49 = arith.negf %48 : vector<2x32xf32>
    %50 = math.exp %49 : vector<2x32xf32>
    %cst_18 = arith.constant 1.000000e+00 : f32
    %51 = vector.broadcast %cst_18 : f32 to vector<2x32xf32>
    %52 = arith.addf %51, %50 : vector<2x32xf32>
    %53 = arith.divf %51, %52 : vector<2x32xf32>
    %54 = vector.extract_strided_slice %41 {offsets = [0, 64], sizes = [2, 32], strides = [1, 1]} : vector<2x128xf32> to vector<2x32xf32>
    %55 = math.tanh %54 : vector<2x32xf32>
    %56 = vector.extract_strided_slice %41 {offsets = [0, 96], sizes = [2, 32], strides = [1, 1]} : vector<2x128xf32> to vector<2x32xf32>
    %57 = arith.negf %56 : vector<2x32xf32>
    %58 = math.exp %57 : vector<2x32xf32>
    %cst_19 = arith.constant 1.000000e+00 : f32
    %59 = vector.broadcast %cst_19 : f32 to vector<2x32xf32>
    %60 = arith.addf %59, %58 : vector<2x32xf32>
    %61 = arith.divf %59, %60 : vector<2x32xf32>
    %62 = arith.mulf %53, %33 : vector<2x32xf32>
    %63 = arith.mulf %47, %55 : vector<2x32xf32>
    %64 = arith.addf %62, %63 : vector<2x32xf32>
    %65 = math.tanh %64 : vector<2x32xf32>
    %66 = arith.mulf %61, %65 : vector<2x32xf32>
    %67 = vector.extract_strided_slice %66 {offsets = [0, 0], sizes = [1, 32], strides = [1, 1]} : vector<2x32xf32> to vector<1x32xf32>
    %c1 = arith.constant 1 : index
    %c0_20 = arith.constant 0 : index
    %68 = vector.load %arg7[%c1, %c0_20] : memref<16x32xf32, #tpu.memory_space<vmem>>, vector<1x32xf32>
    tpu.vector_store %arg7[%c1, %c0_20], %67 {strides = array<i32>} : memref<16x32xf32, #tpu.memory_space<vmem>>, vector<1x32xf32>,
    %69 = vector.extract_strided_slice %66 {offsets = [1, 0], sizes = [1, 32], strides = [1, 1]} : vector<2x32xf32> to vector<1x32xf32>
    %c9 = arith.constant 9 : index
    %c0_21 = arith.constant 0 : index
    %70 = vector.load %arg7[%c9, %c0_21] : memref<16x32xf32, #tpu.memory_space<vmem>>, vector<1x32xf32>
    tpu.vector_store %arg7[%c9, %c0_21], %69 {strides = array<i32>} : memref<16x32xf32, #tpu.memory_space<vmem>>, vector<1x32xf32>,
    %cst_22 = arith.constant dense<0.000000e+00> : vector<2x128xf32>
    %71 = tpu.matmul %66, %0, %cst_22 {dimension_numbers = #tpu.dot_dimension_numbers<[1], [0], [0], [1], [0, 0, 1, 1], [], []>} : vector<2x32xf32>, vector<32x128xf32>, vector<2x128xf32> -> vector<2x128xf32>
    %72 = arith.addf %6, %71 : vector<2x128xf32>
    %73 = vector.extract_strided_slice %72 {offsets = [0, 0], sizes = [2, 32], strides = [1, 1]} : vector<2x128xf32> to vector<2x32xf32>
    %74 = arith.negf %73 : vector<2x32xf32>
    %75 = math.exp %74 : vector<2x32xf32>
    %cst_23 = arith.constant 1.000000e+00 : f32
    %76 = vector.broadcast %cst_23 : f32 to vector<2x32xf32>
    %77 = arith.addf %76, %75 : vector<2x32xf32>
    %78 = arith.divf %76, %77 : vector<2x32xf32>
    %79 = vector.extract_strided_slice %72 {offsets = [0, 32], sizes = [2, 32], strides = [1, 1]} : vector<2x128xf32> to vector<2x32xf32>
    %80 = arith.negf %79 : vector<2x32xf32>
    %81 = math.exp %80 : vector<2x32xf32>
    %cst_24 = arith.constant 1.000000e+00 : f32
    %82 = vector.broadcast %cst_24 : f32 to vector<2x32xf32>
    %83 = arith.addf %82, %81 : vector<2x32xf32>
    %84 = arith.divf %82, %83 : vector<2x32xf32>
    %85 = vector.extract_strided_slice %72 {offsets = [0, 64], sizes = [2, 32], strides = [1, 1]} : vector<2x128xf32> to vector<2x32xf32>
    %86 = math.tanh %85 : vector<2x32xf32>
    %87 = vector.extract_strided_slice %72 {offsets = [0, 96], sizes = [2, 32], strides = [1, 1]} : vector<2x128xf32> to vector<2x32xf32>
    %88 = arith.negf %87 : vector<2x32xf32>
    %89 = math.exp %88 : vector<2x32xf32>
    %cst_25 = arith.constant 1.000000e+00 : f32
    %90 = vector.broadcast %cst_25 : f32 to vector<2x32xf32>
    %91 = arith.addf %90, %89 : vector<2x32xf32>
    %92 = arith.divf %90, %91 : vector<2x32xf32>
    %93 = arith.mulf %84, %64 : vector<2x32xf32>
    %94 = arith.mulf %78, %86 : vector<2x32xf32>
    %95 = arith.addf %93, %94 : vector<2x32xf32>
    %96 = math.tanh %95 : vector<2x32xf32>
    %97 = arith.mulf %92, %96 : vector<2x32xf32>
    %98 = vector.extract_strided_slice %97 {offsets = [0, 0], sizes = [1, 32], strides = [1, 1]} : vector<2x32xf32> to vector<1x32xf32>
    %c2 = arith.constant 2 : index
    %c0_26 = arith.constant 0 : index
    %99 = vector.load %arg7[%c2, %c0_26] : memref<16x32xf32, #tpu.memory_space<vmem>>, vector<1x32xf32>
    tpu.vector_store %arg7[%c2, %c0_26], %98 {strides = array<i32>} : memref<16x32xf32, #tpu.memory_space<vmem>>, vector<1x32xf32>,
    %100 = vector.extract_strided_slice %97 {offsets = [1, 0], sizes = [1, 32], strides = [1, 1]} : vector<2x32xf32> to vector<1x32xf32>
    %c10 = arith.constant 10 : index
    %c0_27 = arith.constant 0 : index
    %101 = vector.load %arg7[%c10, %c0_27] : memref<16x32xf32, #tpu.memory_space<vmem>>, vector<1x32xf32>
    tpu.vector_store %arg7[%c10, %c0_27], %100 {strides = array<i32>} : memref<16x32xf32, #tpu.memory_space<vmem>>, vector<1x32xf32>,
    %cst_28 = arith.constant dense<0.000000e+00> : vector<2x128xf32>
    %102 = tpu.matmul %97, %0, %cst_28 {dimension_numbers = #tpu.dot_dimension_numbers<[1], [0], [0], [1], [0, 0, 1, 1], [], []>} : vector<2x32xf32>, vector<32x128xf32>, vector<2x128xf32> -> vector<2x128xf32>
    %103 = arith.addf %6, %102 : vector<2x128xf32>
    %104 = vector.extract_strided_slice %103 {offsets = [0, 0], sizes = [2, 32], strides = [1, 1]} : vector<2x128xf32> to vector<2x32xf32>
    %105 = arith.negf %104 : vector<2x32xf32>
    %106 = math.exp %105 : vector<2x32xf32>
    %cst_29 = arith.constant 1.000000e+00 : f32
    %107 = vector.broadcast %cst_29 : f32 to vector<2x32xf32>
    %108 = arith.addf %107, %106 : vector<2x32xf32>
    %109 = arith.divf %107, %108 : vector<2x32xf32>
    %110 = vector.extract_strided_slice %103 {offsets = [0, 32], sizes = [2, 32], strides = [1, 1]} : vector<2x128xf32> to vector<2x32xf32>
    %111 = arith.negf %110 : vector<2x32xf32>
    %112 = math.exp %111 : vector<2x32xf32>
    %cst_30 = arith.constant 1.000000e+00 : f32
    %113 = vector.broadcast %cst_30 : f32 to vector<2x32xf32>
    %114 = arith.addf %113, %112 : vector<2x32xf32>
    %115 = arith.divf %113, %114 : vector<2x32xf32>
    %116 = vector.extract_strided_slice %103 {offsets = [0, 64], sizes = [2, 32], strides = [1, 1]} : vector<2x128xf32> to vector<2x32xf32>
    %117 = math.tanh %116 : vector<2x32xf32>
    %118 = vector.extract_strided_slice %103 {offsets = [0, 96], sizes = [2, 32], strides = [1, 1]} : vector<2x128xf32> to vector<2x32xf32>
    %119 = arith.negf %118 : vector<2x32xf32>
    %120 = math.exp %119 : vector<2x32xf32>
    %cst_31 = arith.constant 1.000000e+00 : f32
    %121 = vector.broadcast %cst_31 : f32 to vector<2x32xf32>
    %122 = arith.addf %121, %120 : vector<2x32xf32>
    %123 = arith.divf %121, %122 : vector<2x32xf32>
    %124 = arith.mulf %115, %95 : vector<2x32xf32>
    %125 = arith.mulf %109, %117 : vector<2x32xf32>
    %126 = arith.addf %124, %125 : vector<2x32xf32>
    %127 = math.tanh %126 : vector<2x32xf32>
    %128 = arith.mulf %123, %127 : vector<2x32xf32>
    %129 = vector.extract_strided_slice %128 {offsets = [0, 0], sizes = [1, 32], strides = [1, 1]} : vector<2x32xf32> to vector<1x32xf32>
    %c3 = arith.constant 3 : index
    %c0_32 = arith.constant 0 : index
    %130 = vector.load %arg7[%c3, %c0_32] : memref<16x32xf32, #tpu.memory_space<vmem>>, vector<1x32xf32>
    tpu.vector_store %arg7[%c3, %c0_32], %129 {strides = array<i32>} : memref<16x32xf32, #tpu.memory_space<vmem>>, vector<1x32xf32>,
    %131 = vector.extract_strided_slice %128 {offsets = [1, 0], sizes = [1, 32], strides = [1, 1]} : vector<2x32xf32> to vector<1x32xf32>
    %c11 = arith.constant 11 : index
    %c0_33 = arith.constant 0 : index
    %132 = vector.load %arg7[%c11, %c0_33] : memref<16x32xf32, #tpu.memory_space<vmem>>, vector<1x32xf32>
    tpu.vector_store %arg7[%c11, %c0_33], %131 {strides = array<i32>} : memref<16x32xf32, #tpu.memory_space<vmem>>, vector<1x32xf32>,
    %cst_34 = arith.constant dense<0.000000e+00> : vector<2x128xf32>
    %133 = tpu.matmul %128, %0, %cst_34 {dimension_numbers = #tpu.dot_dimension_numbers<[1], [0], [0], [1], [0, 0, 1, 1], [], []>} : vector<2x32xf32>, vector<32x128xf32>, vector<2x128xf32> -> vector<2x128xf32>
    %134 = arith.addf %6, %133 : vector<2x128xf32>
    %135 = vector.extract_strided_slice %134 {offsets = [0, 0], sizes = [2, 32], strides = [1, 1]} : vector<2x128xf32> to vector<2x32xf32>
    %136 = arith.negf %135 : vector<2x32xf32>
    %137 = math.exp %136 : vector<2x32xf32>
    %cst_35 = arith.constant 1.000000e+00 : f32
    %138 = vector.broadcast %cst_35 : f32 to vector<2x32xf32>
    %139 = arith.addf %138, %137 : vector<2x32xf32>
    %140 = arith.divf %138, %139 : vector<2x32xf32>
    %141 = vector.extract_strided_slice %134 {offsets = [0, 32], sizes = [2, 32], strides = [1, 1]} : vector<2x128xf32> to vector<2x32xf32>
    %142 = arith.negf %141 : vector<2x32xf32>
    %143 = math.exp %142 : vector<2x32xf32>
    %cst_36 = arith.constant 1.000000e+00 : f32
    %144 = vector.broadcast %cst_36 : f32 to vector<2x32xf32>
    %145 = arith.addf %144, %143 : vector<2x32xf32>
    %146 = arith.divf %144, %145 : vector<2x32xf32>
    %147 = vector.extract_strided_slice %134 {offsets = [0, 64], sizes = [2, 32], strides = [1, 1]} : vector<2x128xf32> to vector<2x32xf32>
    %148 = math.tanh %147 : vector<2x32xf32>
    %149 = vector.extract_strided_slice %134 {offsets = [0, 96], sizes = [2, 32], strides = [1, 1]} : vector<2x128xf32> to vector<2x32xf32>
    %150 = arith.negf %149 : vector<2x32xf32>
    %151 = math.exp %150 : vector<2x32xf32>
    %cst_37 = arith.constant 1.000000e+00 : f32
    %152 = vector.broadcast %cst_37 : f32 to vector<2x32xf32>
    %153 = arith.addf %152, %151 : vector<2x32xf32>
    %154 = arith.divf %152, %153 : vector<2x32xf32>
    %155 = arith.mulf %146, %126 : vector<2x32xf32>
    %156 = arith.mulf %140, %148 : vector<2x32xf32>
    %157 = arith.addf %155, %156 : vector<2x32xf32>
    %158 = math.tanh %157 : vector<2x32xf32>
    %159 = arith.mulf %154, %158 : vector<2x32xf32>
    %160 = vector.extract_strided_slice %159 {offsets = [0, 0], sizes = [1, 32], strides = [1, 1]} : vector<2x32xf32> to vector<1x32xf32>
    %c4 = arith.constant 4 : index
    %c0_38 = arith.constant 0 : index
    %161 = vector.load %arg7[%c4, %c0_38] : memref<16x32xf32, #tpu.memory_space<vmem>>, vector<1x32xf32>
    tpu.vector_store %arg7[%c4, %c0_38], %160 {strides = array<i32>} : memref<16x32xf32, #tpu.memory_space<vmem>>, vector<1x32xf32>,
    %162 = vector.extract_strided_slice %159 {offsets = [1, 0], sizes = [1, 32], strides = [1, 1]} : vector<2x32xf32> to vector<1x32xf32>
    %c12 = arith.constant 12 : index
    %c0_39 = arith.constant 0 : index
    %163 = vector.load %arg7[%c12, %c0_39] : memref<16x32xf32, #tpu.memory_space<vmem>>, vector<1x32xf32>
    tpu.vector_store %arg7[%c12, %c0_39], %162 {strides = array<i32>} : memref<16x32xf32, #tpu.memory_space<vmem>>, vector<1x32xf32>,
    %cst_40 = arith.constant dense<0.000000e+00> : vector<2x128xf32>
    %164 = tpu.matmul %159, %0, %cst_40 {dimension_numbers = #tpu.dot_dimension_numbers<[1], [0], [0], [1], [0, 0, 1, 1], [], []>} : vector<2x32xf32>, vector<32x128xf32>, vector<2x128xf32> -> vector<2x128xf32>
    %165 = arith.addf %6, %164 : vector<2x128xf32>
    %166 = vector.extract_strided_slice %165 {offsets = [0, 0], sizes = [2, 32], strides = [1, 1]} : vector<2x128xf32> to vector<2x32xf32>
    %167 = arith.negf %166 : vector<2x32xf32>
    %168 = math.exp %167 : vector<2x32xf32>
    %cst_41 = arith.constant 1.000000e+00 : f32
    %169 = vector.broadcast %cst_41 : f32 to vector<2x32xf32>
    %170 = arith.addf %169, %168 : vector<2x32xf32>
    %171 = arith.divf %169, %170 : vector<2x32xf32>
    %172 = vector.extract_strided_slice %165 {offsets = [0, 32], sizes = [2, 32], strides = [1, 1]} : vector<2x128xf32> to vector<2x32xf32>
    %173 = arith.negf %172 : vector<2x32xf32>
    %174 = math.exp %173 : vector<2x32xf32>
    %cst_42 = arith.constant 1.000000e+00 : f32
    %175 = vector.broadcast %cst_42 : f32 to vector<2x32xf32>
    %176 = arith.addf %175, %174 : vector<2x32xf32>
    %177 = arith.divf %175, %176 : vector<2x32xf32>
    %178 = vector.extract_strided_slice %165 {offsets = [0, 64], sizes = [2, 32], strides = [1, 1]} : vector<2x128xf32> to vector<2x32xf32>
    %179 = math.tanh %178 : vector<2x32xf32>
    %180 = vector.extract_strided_slice %165 {offsets = [0, 96], sizes = [2, 32], strides = [1, 1]} : vector<2x128xf32> to vector<2x32xf32>
    %181 = arith.negf %180 : vector<2x32xf32>
    %182 = math.exp %181 : vector<2x32xf32>
    %cst_43 = arith.constant 1.000000e+00 : f32
    %183 = vector.broadcast %cst_43 : f32 to vector<2x32xf32>
    %184 = arith.addf %183, %182 : vector<2x32xf32>
    %185 = arith.divf %183, %184 : vector<2x32xf32>
    %186 = arith.mulf %177, %157 : vector<2x32xf32>
    %187 = arith.mulf %171, %179 : vector<2x32xf32>
    %188 = arith.addf %186, %187 : vector<2x32xf32>
    %189 = math.tanh %188 : vector<2x32xf32>
    %190 = arith.mulf %185, %189 : vector<2x32xf32>
    %191 = vector.extract_strided_slice %190 {offsets = [0, 0], sizes = [1, 32], strides = [1, 1]} : vector<2x32xf32> to vector<1x32xf32>
    %c5 = arith.constant 5 : index
    %c0_44 = arith.constant 0 : index
    %192 = vector.load %arg7[%c5, %c0_44] : memref<16x32xf32, #tpu.memory_space<vmem>>, vector<1x32xf32>
    tpu.vector_store %arg7[%c5, %c0_44], %191 {strides = array<i32>} : memref<16x32xf32, #tpu.memory_space<vmem>>, vector<1x32xf32>,
    %193 = vector.extract_strided_slice %190 {offsets = [1, 0], sizes = [1, 32], strides = [1, 1]} : vector<2x32xf32> to vector<1x32xf32>
    %c13 = arith.constant 13 : index
    %c0_45 = arith.constant 0 : index
    %194 = vector.load %arg7[%c13, %c0_45] : memref<16x32xf32, #tpu.memory_space<vmem>>, vector<1x32xf32>
    tpu.vector_store %arg7[%c13, %c0_45], %193 {strides = array<i32>} : memref<16x32xf32, #tpu.memory_space<vmem>>, vector<1x32xf32>,
    %cst_46 = arith.constant dense<0.000000e+00> : vector<2x128xf32>
    %195 = tpu.matmul %190, %0, %cst_46 {dimension_numbers = #tpu.dot_dimension_numbers<[1], [0], [0], [1], [0, 0, 1, 1], [], []>} : vector<2x32xf32>, vector<32x128xf32>, vector<2x128xf32> -> vector<2x128xf32>
    %196 = arith.addf %6, %195 : vector<2x128xf32>
    %197 = vector.extract_strided_slice %196 {offsets = [0, 0], sizes = [2, 32], strides = [1, 1]} : vector<2x128xf32> to vector<2x32xf32>
    %198 = arith.negf %197 : vector<2x32xf32>
    %199 = math.exp %198 : vector<2x32xf32>
    %cst_47 = arith.constant 1.000000e+00 : f32
    %200 = vector.broadcast %cst_47 : f32 to vector<2x32xf32>
    %201 = arith.addf %200, %199 : vector<2x32xf32>
    %202 = arith.divf %200, %201 : vector<2x32xf32>
    %203 = vector.extract_strided_slice %196 {offsets = [0, 32], sizes = [2, 32], strides = [1, 1]} : vector<2x128xf32> to vector<2x32xf32>
    %204 = arith.negf %203 : vector<2x32xf32>
    %205 = math.exp %204 : vector<2x32xf32>
    %cst_48 = arith.constant 1.000000e+00 : f32
    %206 = vector.broadcast %cst_48 : f32 to vector<2x32xf32>
    %207 = arith.addf %206, %205 : vector<2x32xf32>
    %208 = arith.divf %206, %207 : vector<2x32xf32>
    %209 = vector.extract_strided_slice %196 {offsets = [0, 64], sizes = [2, 32], strides = [1, 1]} : vector<2x128xf32> to vector<2x32xf32>
    %210 = math.tanh %209 : vector<2x32xf32>
    %211 = vector.extract_strided_slice %196 {offsets = [0, 96], sizes = [2, 32], strides = [1, 1]} : vector<2x128xf32> to vector<2x32xf32>
    %212 = arith.negf %211 : vector<2x32xf32>
    %213 = math.exp %212 : vector<2x32xf32>
    %cst_49 = arith.constant 1.000000e+00 : f32
    %214 = vector.broadcast %cst_49 : f32 to vector<2x32xf32>
    %215 = arith.addf %214, %213 : vector<2x32xf32>
    %216 = arith.divf %214, %215 : vector<2x32xf32>
    %217 = arith.mulf %208, %188 : vector<2x32xf32>
    %218 = arith.mulf %202, %210 : vector<2x32xf32>
    %219 = arith.addf %217, %218 : vector<2x32xf32>
    %220 = math.tanh %219 : vector<2x32xf32>
    %221 = arith.mulf %216, %220 : vector<2x32xf32>
    %222 = vector.extract_strided_slice %221 {offsets = [0, 0], sizes = [1, 32], strides = [1, 1]} : vector<2x32xf32> to vector<1x32xf32>
    %c6 = arith.constant 6 : index
    %c0_50 = arith.constant 0 : index
    %223 = vector.load %arg7[%c6, %c0_50] : memref<16x32xf32, #tpu.memory_space<vmem>>, vector<1x32xf32>
    tpu.vector_store %arg7[%c6, %c0_50], %222 {strides = array<i32>} : memref<16x32xf32, #tpu.memory_space<vmem>>, vector<1x32xf32>,
    %224 = vector.extract_strided_slice %221 {offsets = [1, 0], sizes = [1, 32], strides = [1, 1]} : vector<2x32xf32> to vector<1x32xf32>
    %c14 = arith.constant 14 : index
    %c0_51 = arith.constant 0 : index
    %225 = vector.load %arg7[%c14, %c0_51] : memref<16x32xf32, #tpu.memory_space<vmem>>, vector<1x32xf32>
    tpu.vector_store %arg7[%c14, %c0_51], %224 {strides = array<i32>} : memref<16x32xf32, #tpu.memory_space<vmem>>, vector<1x32xf32>,
    %cst_52 = arith.constant dense<0.000000e+00> : vector<2x128xf32>
    %226 = tpu.matmul %221, %0, %cst_52 {dimension_numbers = #tpu.dot_dimension_numbers<[1], [0], [0], [1], [0, 0, 1, 1], [], []>} : vector<2x32xf32>, vector<32x128xf32>, vector<2x128xf32> -> vector<2x128xf32>
    %227 = arith.addf %6, %226 : vector<2x128xf32>
    %228 = vector.extract_strided_slice %227 {offsets = [0, 0], sizes = [2, 32], strides = [1, 1]} : vector<2x128xf32> to vector<2x32xf32>
    %229 = arith.negf %228 : vector<2x32xf32>
    %230 = math.exp %229 : vector<2x32xf32>
    %cst_53 = arith.constant 1.000000e+00 : f32
    %231 = vector.broadcast %cst_53 : f32 to vector<2x32xf32>
    %232 = arith.addf %231, %230 : vector<2x32xf32>
    %233 = arith.divf %231, %232 : vector<2x32xf32>
    %234 = vector.extract_strided_slice %227 {offsets = [0, 32], sizes = [2, 32], strides = [1, 1]} : vector<2x128xf32> to vector<2x32xf32>
    %235 = arith.negf %234 : vector<2x32xf32>
    %236 = math.exp %235 : vector<2x32xf32>
    %cst_54 = arith.constant 1.000000e+00 : f32
    %237 = vector.broadcast %cst_54 : f32 to vector<2x32xf32>
    %238 = arith.addf %237, %236 : vector<2x32xf32>
    %239 = arith.divf %237, %238 : vector<2x32xf32>
    %240 = vector.extract_strided_slice %227 {offsets = [0, 64], sizes = [2, 32], strides = [1, 1]} : vector<2x128xf32> to vector<2x32xf32>
    %241 = math.tanh %240 : vector<2x32xf32>
    %242 = vector.extract_strided_slice %227 {offsets = [0, 96], sizes = [2, 32], strides = [1, 1]} : vector<2x128xf32> to vector<2x32xf32>
    %243 = arith.negf %242 : vector<2x32xf32>
    %244 = math.exp %243 : vector<2x32xf32>
    %cst_55 = arith.constant 1.000000e+00 : f32
    %245 = vector.broadcast %cst_55 : f32 to vector<2x32xf32>
    %246 = arith.addf %245, %244 : vector<2x32xf32>
    %247 = arith.divf %245, %246 : vector<2x32xf32>
    %248 = arith.mulf %239, %219 : vector<2x32xf32>
    %249 = arith.mulf %233, %241 : vector<2x32xf32>
    %250 = arith.addf %248, %249 : vector<2x32xf32>
    %251 = math.tanh %250 : vector<2x32xf32>
    %252 = arith.mulf %247, %251 : vector<2x32xf32>
    %253 = vector.extract_strided_slice %252 {offsets = [0, 0], sizes = [1, 32], strides = [1, 1]} : vector<2x32xf32> to vector<1x32xf32>
    %c7 = arith.constant 7 : index
    %c0_56 = arith.constant 0 : index
    %254 = vector.load %arg7[%c7, %c0_56] : memref<16x32xf32, #tpu.memory_space<vmem>>, vector<1x32xf32>
    tpu.vector_store %arg7[%c7, %c0_56], %253 {strides = array<i32>} : memref<16x32xf32, #tpu.memory_space<vmem>>, vector<1x32xf32>,
    %255 = vector.extract_strided_slice %252 {offsets = [1, 0], sizes = [1, 32], strides = [1, 1]} : vector<2x32xf32> to vector<1x32xf32>
    %c15 = arith.constant 15 : index
    %c0_57 = arith.constant 0 : index
    %256 = vector.load %arg7[%c15, %c0_57] : memref<16x32xf32, #tpu.memory_space<vmem>>, vector<1x32xf32>
    tpu.vector_store %arg7[%c15, %c0_57], %255 {strides = array<i32>} : memref<16x32xf32, #tpu.memory_space<vmem>>, vector<1x32xf32>,
    %c0_58 = arith.constant 0 : index
    %c0_59 = arith.constant 0 : index
    %257 = vector.load %arg7[%c0_58, %c0_59] : memref<16x32xf32, #tpu.memory_space<vmem>>, vector<16x32xf32>
    %c0_60 = arith.constant 0 : index
    %c0_61 = arith.constant 0 : index
    %258 = vector.load %arg4[%c0_60, %c0_61] : memref<32x2xf32, #tpu.memory_space<vmem>>, vector<32x2xf32>
    %cst_62 = arith.constant dense<0.000000e+00> : vector<16x2xf32>
    %259 = tpu.matmul %257, %258, %cst_62 {dimension_numbers = #tpu.dot_dimension_numbers<[1], [0], [0], [1], [0, 0, 1, 1], [], []>} : vector<16x32xf32>, vector<32x2xf32>, vector<16x2xf32> -> vector<16x2xf32>
    %c0_63 = arith.constant 0 : index
    %c0_64 = arith.constant 0 : index
    %260 = vector.load %arg5[%c0_63, %c0_64] : memref<1x2xf32, #tpu.memory_space<vmem>>, vector<1x2xf32>
    %261 = vector.broadcast %260 : vector<1x2xf32> to vector<16x2xf32>
    %262 = arith.addf %259, %261 : vector<16x2xf32>
    %263 = vector.shape_cast %262 : vector<16x2xf32> to vector<2x8x2xf32>
    %c0_65 = arith.constant 0 : index
    %c0_66 = arith.constant 0 : index
    %c0_67 = arith.constant 0 : index
    %264 = vector.load %arg6[%c0_65, %c0_66, %c0_67] : memref<2x8x2xf32, #tpu.memory_space<vmem>>, vector<2x8x2xf32>
    tpu.vector_store %arg6[%c0_65, %c0_66, %c0_67], %263 {strides = array<i32>} : memref<2x8x2xf32, #tpu.memory_space<vmem>>, vector<2x8x2xf32>,
    return
  }
}

</mosaic_0001>

<bundles_post_ra>
// kernel: tpu_custom_call.1
= control target key start
LH: loop header
LB: loop body
LE: loop exit
PB: predicated region body
PF: predicated region fallthrough
CT: control target
= control target key end

     0   :  { %11 = vsyncpa [#allocation4], 0  ;;  %s1385_s21 = smov [#allocation3]   ;;  %s1602_s0 = inlined_call_operand.vmem [shape: f32[2,16], index: 0, kind: input, shape index: {}]   ;;  %s1603_s1 = inlined_call_operand.hbm [shape: f32[16,128], index: 1, kind: input, shape index: {}]   ;;  %s1604_s2 = inlined_call_operand.vmem [shape: f32[32,128], index: 2, kind: input, shape index: {}]   ;;  %s1605_s3 = inlined_call_operand.vmem [shape: f32[1,128], index: 3, kind: input, shape index: {}]   ;;  %s1606_s4 = inlined_call_operand.vmem [shape: f32[32,2], index: 4, kind: input, shape index: {}]   ;;  %s1607_s5 = inlined_call_operand.vmem [shape: f32[1,2], index: 5, kind: input, shape index: {}]   ;;  %s1608_s6 = inlined_call_operand.vmem [shape: f32[2,8,2], index: 6, kind: output, shape index: {}]  }
   0x1   :  { %s19_s22 = sshll.u32 %s1385_s21, 4  ;;  %s1361_s25 = scalar_lea.hbm %s1603_s1, 256  ;;  %s20_s22 = int_to_ptr.vmem [resolvable:$true] %s19_s22 }
   0x2   :  { %p1362_p0 = scmp.ne.s32.totalorder %s1603_s1, %s1361_s25  ;;  %p1365_p1 = scmp.lt.u32.totalorder %s1361_s25, %s1603_s1 }
   0x4   :  { %p1367_p2 = pnand %p1365_p1, %p1362_p0 }
   0x6   :  { %1370 = shalt.err (!%p1367_p2)
}
   0x7   :  { %s1371_s30 = scalar_lea.vmem %s20_s22, 256  ;;  %p1376_p4 = scmp.lt.s32.totalorder %s20_s22, %s20_s22 }
   0x8   :  { %p1372_p3 = scmp.ne.s32.totalorder %s20_s22, %s1371_s30  ;;  %p1377_p5 = scmp.lt.s32.totalorder %s1371_s30, %s1371_s30 }
   0xa   :  { %p1378_p6 = por %p1377_p5, %p1376_p4 }
   0xc   :  { %p1379_p7 = pnand %p1378_p6, %p1372_p3 }
   0xe   :  { %1382 = shalt.err (!%p1379_p7)
}
   0xf   :  { %s1386_s7 = smov 128   ;;  %s1387_s8 = smov 8  }
  0x10   :  { %25 = dma.hbm_to_vmem [thread:$0]  %s1603_s1, 256, %s20_s22, [#allocation4], %s1386_s7, %s1386_s7, %s1387_s8  }
  0x11   :  { %1383 = dma.done.wait [#allocation4], 256  }
  0x12   :  { %1384 = vsyncadd [#allocation4], 4294967040  ;;  %v1388_v0 = vmov 0.0|0.0   ;;  %vm1389_vm0 = vmmov 0   ;;  %v1390_v1 = vmov 0.0   ;;  %v37_v2 = vld [vmem:[%s1604_s2] sm:$0xff] }
  0x13   :  { %1233 = vmatprep.subr.bf16.mxu1 %v1388_v0  ;;  %1230 = vmatprep.subr.bf16.mxu0 %v1388_v0  ;;  %v38_v3 = vld [vmem:[%s1604_s2 + $0x8] sm:$0xff]  ;;  %v42_v4 = vld [vmem:[#allocation3] sm:$0xff]  ;;  %v43_v6 = vld [vmem:[#allocation3 + $0x8] sm:$0xff]  ;;  %vm51_vm1 = vcmask 130048   ;;  %s1391_s20 = smov 64   ;;  %vm228_vm2 = vcmask 253952  }
  0x14   :  { %1128 = vmatprep.mubr.msk.f32.mxu0 %vm1389_vm0, %v1390_v1  ;;  %1139 = vmatprep.mubr.msk.f32.mxu1 %vm1389_vm0, %v1390_v1  ;;  %v1452_v5 = vpack.c.bf16 %v38_v3, %v37_v2  ;;  %v39_v7 = vld [vmem:[%s1604_s2 + $0x10] sm:$0xff]  ;;  %v1231_v8 = vpack.c.bf16 %v43_v6, %v42_v4  ;;  %v40_v9 = vld [vmem:[%s1604_s2 + $0x18] sm:$0xff]  ;;  %v41_v11 = vld [vmem:[%s1602_s0] sm:$0x3]  ;;  %vm230_vm3 = vcmask 254977   ;;  %vm125_vm4 = vcmask 261120  }
  0x15   :  { %v1461_v10 = vpack.c.bf16 %v40_v9, %v39_v7  ;;  %v1055_v12 = vld [vmem:[%s1605_s3] ss:$0 sm:$0xff]  ;;  %s1392_s3 = smov 32   ;;  %vm1047_vm5 = vcmask 15360  }
  0x16   :  { %1235 = vmatpush3.bf16.msra.mxu1 %v1452_v5  ;;  %1232 = vmatpush3.bf16.msra.mxu0 %v1231_v8 }
  0x17   :  { %1236 = vmatprep.subr.bf16.mxu1 %v1388_v0  ;;  %1239 = vmatprep.subr.bf16.mxu0 %v1388_v0 }
  0x19   :  { %1129 = vmatmul.mubr.msk.f32.vlgmr.msra.gmra.mrb[0].mxu0 %vm51_vm1, %v41_v11 }
  0x1a   :  { %1238 = vmatpush3.bf16.msra.mxu1 %v1461_v10  ;;  %1241 = vmatpush3.bf16.msra.mxu0 %v1452_v5 }
  0x1b   :  { %1150 = vmatprep.mubr.msk.f32.mxu0 %vm1389_vm0, %v1390_v1  ;;  %1242 = vmatprep.subr.bf16.mxu0 %v1388_v0 }
  0x1c   :  { %1245 = vmatprep.subr.bf16.mxu1 %v1388_v0 }
  0x1d   :  { %1140 = vmatmul.mubr.f32.vlgmr.msra.gmra.mrb[0].mxu1 %v1390_v1 }
  0x1e   :  { %1247 = vmatpush3.bf16.msra.mxu1 %v1452_v5  ;;  %1161 = vmatprep.mubr.msk.f32.mxu1 %vm1389_vm0, %v1390_v1 }
  0x1f   :  { %1244 = vmatpush3.bf16.msra.mxu0 %v1461_v10  ;;  %1248 = vmatprep.subr.bf16.mxu1 %v1388_v0 }
  0x20   :  { %1251 = vmatprep.subr.bf16.mxu0 %v1388_v0 }
  0x22   :  { %1250 = vmatpush3.bf16.msra.mxu1 %v1461_v10 }
  0x23   :  { %1257 = vmatprep.subr.bf16.mxu1 %v1388_v0 }
  0xec   :  { %v121_v13 = vpop.f32.mrb[0].mxu0 }
  0xed   :  { %v1486_v14 = vadd.f32 %v1055_v12, %v121_v13  ;;  %v1130_v15 = vpop.f32.mrb[1].mxu0 }
  0xf0   :  { %v195_v16 = vpop.f32.mrb[0].mxu1 }
  0xf1   :  { %v199_v17 = vadd.f32 %v195_v16, %v1486_v14  ;;  %v1141_v18 = vpop.f32.mrb[1].mxu1 }
  0xf3   :  { %1297 = vtanh.f32 %v199_v17  ;;  %v1057_v20 = vmul.f32 -1.442695, %v199_v17 }
  0xf5   :  { %1299 = vpow2.f32 %v1057_v20 }
  0xfd   :  { %v1298_v19 = vpop.eup %1297 }
  0xfe   :  { %209 = vrot.lane.b32.xlu0 %v1298_v19, %s1391_s20 }
  0xff   :  { %v1300_v21 = vpop.eup %1299 }
 0x100   :  { %v203_v22 = vadd.f32 1.0, %v1300_v21 }
 0x102   :  { %1301 = vrcp.f32 %v203_v22 }
 0x10c   :  { %v1302_v23 = vpop.eup %1301 }
 0x10d   :  { %v207_v26 = vmul.f32 0.0, %v1302_v23 }
 0x170   :  { %v210_v24 = vpop.permute.xlu0 %209 }
 0x171   :  { %v212_v25 = vmul.f32 %v1302_v23, %v210_v24 }
 0x173   :  { %214 = vrot.lane.b32.xlu0 %v212_v25, %s1392_s3 }
 0x1e5   :  { %v215_v27 = vpop.permute.xlu0 %214 }
 0x1e6   :  { %v217_v28 = vadd.f32 %v215_v27, %v207_v26 }
 0x1e8   :  { %1303 = vtanh.f32 %v217_v28 }
 0x1f2   :  { %v1304_v29 = vpop.eup %1303 }
 0x1f3   :  { %220 = vrot.lane.b32.xlu1 %v1304_v29, %s1391_s20 }
 0x265   :  { %v221_v30 = vpop.permute.xlu1 %220 }
 0x266   :  { %v223_v31 = vmul.f32 %v1302_v23, %v221_v30 }
 0x268   :  { %225 = vrot.lane.b32.xlu1 %v223_v31, %s1392_s3 }
 0x2da   :  { %v226_v32 = vpop.permute.xlu1 %225 }
 0x2db   :  { %229 = vst.msk [vmem:[#allocation2] sm:$0x1] %vm228_vm2, %v226_v32  ;;  %1151 = vmatmul.mubr.msk.f32.vlgmr.msra.gmra.mrb[2].mxu0 %vm125_vm4, %v226_v32 }
 0x2dc   :  { %231 = vst.msk [vmem:[#allocation2 + $0x7] sm:$0x2] %vm230_vm3, %v226_v32  ;;  %1253 = vmatpush3.bf16.msra.mxu0 %v1452_v5  ;;  %1172 = vmatprep.mubr.msk.f32.mxu0 %vm1389_vm0, %v1390_v1 }
 0x2dd   :  { %1254 = vmatprep.subr.bf16.mxu0 %v1388_v0 }
 0x2e0   :  { %1256 = vmatpush3.bf16.msra.mxu0 %v1461_v10 }
 0x2e1   :  { %1263 = vmatprep.subr.bf16.mxu0 %v1388_v0 }
 0x3ae   :  { %v300_v33 = vpop.f32.mrb[2].mxu0 }
 0x3af   :  { %v304_v34 = vadd.f32 %v300_v33, %v1486_v14  ;;  %v1152_v35 = vpop.f32.mrb[3].mxu0 }
 0x3b1   :  { %1305 = vtanh.f32 %v304_v34  ;;  %v1059_v37 = vmul.f32 -1.442695, %v304_v34 }
 0x3b3   :  { %1307 = vpow2.f32 %v1059_v37 }
 0x3bb   :  { %v1306_v36 = vpop.eup %1305 }
 0x3bc   :  { %314 = vrot.lane.b32.xlu0 %v1306_v36, %s1391_s20 }
 0x3bd   :  { %v1308_v38 = vpop.eup %1307 }
 0x3be   :  { %v308_v39 = vadd.f32 1.0, %v1308_v38 }
 0x3c0   :  { %1309 = vrcp.f32 %v308_v39 }
 0x3ca   :  { %v1310_v40 = vpop.eup %1309 }
 0x3cb   :  { %v312_v43 = vmul.f32 %v1310_v40, %v217_v28 }
 0x42e   :  { %v315_v41 = vpop.permute.xlu0 %314 }
 0x42f   :  { %v317_v42 = vmul.f32 %v1310_v40, %v315_v41 }
 0x431   :  { %319 = vrot.lane.b32.xlu1 %v317_v42, %s1392_s3 }
 0x4a3   :  { %v320_v44 = vpop.permute.xlu1 %319 }
 0x4a4   :  { %v322_v45 = vadd.f32 %v320_v44, %v312_v43 }
 0x4a6   :  { %1311 = vtanh.f32 %v322_v45 }
 0x4b0   :  { %v1312_v46 = vpop.eup %1311 }
 0x4b1   :  { %325 = vrot.lane.b32.xlu0 %v1312_v46, %s1391_s20 }
 0x523   :  { %v326_v47 = vpop.permute.xlu0 %325 }
 0x524   :  { %v328_v48 = vmul.f32 %v1310_v40, %v326_v47 }
 0x526   :  { %330 = vrot.lane.b32.xlu1 %v328_v48, %s1392_s3 }
 0x598   :  { %v331_v49 = vpop.permute.xlu1 %330 }
 0x599   :  { %333 = vst.msk [vmem:[#allocation2 + $0x1] sm:$0x1] %vm228_vm2, %v331_v49  ;;  %1162 = vmatmul.mubr.msk.f32.vlgmr.msra.gmra.mrb[2].mxu1 %vm125_vm4, %v331_v49 }
 0x59a   :  { %334 = vst.msk [vmem:[#allocation2 + $0x8] sm:$0x2] %vm230_vm3, %v331_v49  ;;  %1259 = vmatpush3.bf16.msra.mxu1 %v1452_v5  ;;  %1183 = vmatprep.mubr.msk.f32.mxu1 %vm1389_vm0, %v1390_v1 }
 0x59b   :  { %1260 = vmatprep.subr.bf16.mxu1 %v1388_v0 }
 0x59e   :  { %1262 = vmatpush3.bf16.msra.mxu1 %v1461_v10 }
 0x59f   :  { %1269 = vmatprep.subr.bf16.mxu1 %v1388_v0 }
 0x66c   :  { %v403_v50 = vpop.f32.mrb[2].mxu1 }
 0x66d   :  { %v407_v51 = vadd.f32 %v403_v50, %v1486_v14  ;;  %v1163_v52 = vpop.f32.mrb[3].mxu1 }
 0x66f   :  { %1313 = vtanh.f32 %v407_v51  ;;  %v1061_v54 = vmul.f32 -1.442695, %v407_v51 }
 0x671   :  { %1315 = vpow2.f32 %v1061_v54 }
 0x679   :  { %v1314_v53 = vpop.eup %1313 }
 0x67a   :  { %417 = vrot.lane.b32.xlu0 %v1314_v53, %s1391_s20 }
 0x67b   :  { %v1316_v55 = vpop.eup %1315 }
 0x67c   :  { %v411_v56 = vadd.f32 1.0, %v1316_v55 }
 0x67e   :  { %1317 = vrcp.f32 %v411_v56 }
 0x688   :  { %v1318_v57 = vpop.eup %1317 }
 0x689   :  { %v415_v60 = vmul.f32 %v1318_v57, %v322_v45 }
 0x6ec   :  { %v418_v58 = vpop.permute.xlu0 %417 }
 0x6ed   :  { %v420_v59 = vmul.f32 %v1318_v57, %v418_v58 }
 0x6ef   :  { %422 = vrot.lane.b32.xlu1 %v420_v59, %s1392_s3 }
 0x761   :  { %v423_v61 = vpop.permute.xlu1 %422 }
 0x762   :  { %v425_v62 = vadd.f32 %v423_v61, %v415_v60 }
 0x764   :  { %1319 = vtanh.f32 %v425_v62 }
 0x76e   :  { %v1320_v63 = vpop.eup %1319 }
 0x76f   :  { %428 = vrot.lane.b32.xlu0 %v1320_v63, %s1391_s20 }
 0x7e1   :  { %v429_v2 = vpop.permute.xlu0 %428 }
 0x7e2   :  { %v431_v3 = vmul.f32 %v1318_v57, %v429_v2 }
 0x7e4   :  { %433 = vrot.lane.b32.xlu1 %v431_v3, %s1392_s3 }
 0x856   :  { %v434_v4 = vpop.permute.xlu1 %433 }
 0x857   :  { %436 = vst.msk [vmem:[#allocation2 + $0x2] sm:$0x1] %vm228_vm2, %v434_v4  ;;  %1173 = vmatmul.mubr.msk.f32.vlgmr.msra.gmra.mrb[4].mxu0 %vm125_vm4, %v434_v4 }
 0x858   :  { %437 = vst.msk [vmem:[#allocation2 + $0x9] sm:$0x2] %vm230_vm3, %v434_v4  ;;  %1265 = vmatpush3.bf16.msra.mxu0 %v1452_v5  ;;  %1194 = vmatprep.mubr.msk.f32.mxu0 %vm1389_vm0, %v1390_v1 }
 0x859   :  { %1266 = vmatprep.subr.bf16.mxu0 %v1388_v0 }
 0x85c   :  { %1268 = vmatpush3.bf16.msra.mxu0 %v1461_v10 }
 0x85d   :  { %1275 = vmatprep.subr.bf16.mxu0 %v1388_v0 }
 0x92a   :  { %v506_v6 = vpop.f32.mrb[4].mxu0 }
 0x92b   :  { %v510_v7 = vadd.f32 %v506_v6, %v1486_v14  ;;  %v1174_v8 = vpop.f32.mrb[5].mxu0 }
 0x92d   :  { %1321 = vtanh.f32 %v510_v7  ;;  %v1063_v11 = vmul.f32 -1.442695, %v510_v7 }
 0x92f   :  { %1323 = vpow2.f32 %v1063_v11 }
 0x937   :  { %v1322_v9 = vpop.eup %1321 }
 0x938   :  { %520 = vrot.lane.b32.xlu0 %v1322_v9, %s1391_s20 }
 0x939   :  { %v1324_v12 = vpop.eup %1323 }
 0x93a   :  { %v514_v13 = vadd.f32 1.0, %v1324_v12 }
 0x93c   :  { %1325 = vrcp.f32 %v514_v13 }
 0x946   :  { %v1326_v15 = vpop.eup %1325 }
 0x947   :  { %v518_v18 = vmul.f32 %v1326_v15, %v425_v62 }
 0x9aa   :  { %v521_v16 = vpop.permute.xlu0 %520 }
 0x9ab   :  { %v523_v17 = vmul.f32 %v1326_v15, %v521_v16 }
 0x9ad   :  { %525 = vrot.lane.b32.xlu1 %v523_v17, %s1392_s3 }
 0xa1f   :  { %v526_v19 = vpop.permute.xlu1 %525 }
 0xa20   :  { %v528_v20 = vadd.f32 %v526_v19, %v518_v18 }
 0xa22   :  { %1327 = vtanh.f32 %v528_v20 }
 0xa2c   :  { %v1328_v21 = vpop.eup %1327 }
 0xa2d   :  { %531 = vrot.lane.b32.xlu0 %v1328_v21, %s1391_s20 }
 0xa9f   :  { %v532_v22 = vpop.permute.xlu0 %531 }
 0xaa0   :  { %v534_v23 = vmul.f32 %v1326_v15, %v532_v22 }
 0xaa2   :  { %536 = vrot.lane.b32.xlu1 %v534_v23, %s1392_s3 }
 0xb14   :  { %v537_v24 = vpop.permute.xlu1 %536 }
 0xb15   :  { %539 = vst.msk [vmem:[#allocation2 + $0x3] sm:$0x1] %vm228_vm2, %v537_v24  ;;  %1184 = vmatmul.mubr.msk.f32.vlgmr.msra.gmra.mrb[4].mxu1 %vm125_vm4, %v537_v24 }
 0xb16   :  { %540 = vst.msk [vmem:[#allocation2 + $0xa] sm:$0x2] %vm230_vm3, %v537_v24  ;;  %1271 = vmatpush3.bf16.msra.mxu1 %v1452_v5  ;;  %1205 = vmatprep.mubr.msk.f32.mxu1 %vm1389_vm0, %v1390_v1 }
 0xb17   :  { %1272 = vmatprep.subr.bf16.mxu1 %v1388_v0 }
 0xb1a   :  { %1274 = vmatpush3.bf16.msra.mxu1 %v1461_v10 }
 0xbe8   :  { %v609_v25 = vpop.f32.mrb[4].mxu1 }
 0xbe9   :  { %v613_v26 = vadd.f32 %v609_v25, %v1486_v14  ;;  %v1185_v27 = vpop.f32.mrb[5].mxu1 }
 0xbea   :  { %v956_v27 = vld [vmem:[%s1606_s4 + $0x8] sm:$0xff] }
 0xbeb   :  { %1329 = vtanh.f32 %v613_v26  ;;  %v1065_v29 = vmul.f32 -1.442695, %v613_v26  ;;  %v955_v26 = vld [vmem:[%s1606_s4] sm:$0xff] }
 0xbed   :  { %1331 = vpow2.f32 %v1065_v29  ;;  %v957_v29 = vld [vmem:[%s1606_s4 + $0x10] sm:$0xff] }
 0xbf5   :  { %v1330_v28 = vpop.eup %1329 }
 0xbf6   :  { %623 = vrot.lane.b32.xlu0 %v1330_v28, %s1391_s20  ;;  %v1281_v28 = vpack.c.bf16 %v956_v27, %v955_v26 }
 0xbf7   :  { %v1332_v30 = vpop.eup %1331 }
 0xbf8   :  { %v617_v31 = vadd.f32 1.0, %v1332_v30  ;;  %v958_v30 = vld [vmem:[%s1606_s4 + $0x18] sm:$0xff]  ;;  %1282 = vmatprep.subr.bf16.mxu1 %v1281_v28 }
 0xbfa   :  { %1333 = vrcp.f32 %v617_v31  ;;  %v1285_v31 = vpack.c.bf16 %v958_v30, %v957_v29 }
 0xc04   :  { %v1334_v32 = vpop.eup %1333 }
 0xc05   :  { %v621_v35 = vmul.f32 %v1334_v32, %v528_v20 }
 0xc68   :  { %v624_v33 = vpop.permute.xlu0 %623 }
 0xc69   :  { %v626_v34 = vmul.f32 %v1334_v32, %v624_v33 }
 0xc6b   :  { %628 = vrot.lane.b32.xlu1 %v626_v34, %s1392_s3 }
 0xcdd   :  { %v629_v36 = vpop.permute.xlu1 %628 }
 0xcde   :  { %v631_v37 = vadd.f32 %v629_v36, %v621_v35 }
 0xce0   :  { %1335 = vtanh.f32 %v631_v37 }
 0xcea   :  { %v1336_v38 = vpop.eup %1335 }
 0xceb   :  { %634 = vrot.lane.b32.xlu0 %v1336_v38, %s1391_s20 }
 0xd5d   :  { %v635_v39 = vpop.permute.xlu0 %634 }
 0xd5e   :  { %v637_v40 = vmul.f32 %v1334_v32, %v635_v39 }
 0xd60   :  { %639 = vrot.lane.b32.xlu1 %v637_v40, %s1392_s3 }
 0xdd2   :  { %v640_v41 = vpop.permute.xlu1 %639 }
 0xdd3   :  { %642 = vst.msk [vmem:[#allocation2 + $0x4] sm:$0x1] %vm228_vm2, %v640_v41  ;;  %1195 = vmatmul.mubr.msk.f32.vlgmr.msra.gmra.mrb[6].mxu0 %vm125_vm4, %v640_v41 }
 0xdd4   :  { %643 = vst.msk [vmem:[#allocation2 + $0xb] sm:$0x2] %vm230_vm3, %v640_v41  ;;  %1277 = vmatpush3.bf16.msra.mxu0 %v1452_v5  ;;  %1216 = vmatprep.mubr.msk.f32.mxu0 %vm1389_vm0, %v1390_v1 }
 0xdd5   :  { %1278 = vmatprep.subr.bf16.mxu0 %v1388_v0 }
 0xdd8   :  { %1280 = vmatpush3.bf16.msra.mxu0 %v1461_v10 }
 0xea6   :  { %v712_v42 = vpop.f32.mrb[6].mxu0 }
 0xea7   :  { %v716_v43 = vadd.f32 %v712_v42, %v1486_v14  ;;  %v1196_v44 = vpop.f32.mrb[7].mxu0 }
 0xea9   :  { %1337 = vtanh.f32 %v716_v43  ;;  %v1067_v46 = vmul.f32 -1.442695, %v716_v43 }
 0xeab   :  { %1339 = vpow2.f32 %v1067_v46 }
 0xeb3   :  { %v1338_v45 = vpop.eup %1337 }
 0xeb4   :  { %726 = vrot.lane.b32.xlu0 %v1338_v45, %s1391_s20 }
 0xeb5   :  { %v1340_v47 = vpop.eup %1339 }
 0xeb6   :  { %v720_v48 = vadd.f32 1.0, %v1340_v47 }
 0xeb8   :  { %1341 = vrcp.f32 %v720_v48 }
 0xec2   :  { %v1342_v5 = vpop.eup %1341 }
 0xec3   :  { %v724_v0 = vmul.f32 %v1342_v5, %v631_v37  ;;  %v1072_v37 = vld [vmem:[%s1607_s5] ss:$0 sm:$0xff] }
 0xf26   :  { %v727_v49 = vpop.permute.xlu0 %726 }
 0xf27   :  { %v729_v1 = vmul.f32 %v1342_v5, %v727_v49 }
 0xf29   :  { %731 = vrot.lane.b32.xlu1 %v729_v1, %s1392_s3 }
 0xf9b   :  { %v732_v10 = vpop.permute.xlu1 %731 }
 0xf9c   :  { %v734_v50 = vadd.f32 %v732_v10, %v724_v0 }
 0xf9e   :  { %1343 = vtanh.f32 %v734_v50 }
 0xfa8   :  { %v1344_v51 = vpop.eup %1343 }
 0xfa9   :  { %737 = vrot.lane.b32.xlu0 %v1344_v51, %s1391_s20 }
0x101b   :  { %v738_v52 = vpop.permute.xlu0 %737 }
0x101c   :  { %v740_v53 = vmul.f32 %v1342_v5, %v738_v52 }
0x101e   :  { %742 = vrot.lane.b32.xlu1 %v740_v53, %s1392_s3 }
0x1090   :  { %v743_v54 = vpop.permute.xlu1 %742 }
0x1091   :  { %745 = vst.msk [vmem:[#allocation2 + $0x5] sm:$0x1] %vm228_vm2, %v743_v54  ;;  %1206 = vmatmul.mubr.msk.f32.vlgmr.msra.gmra.mrb[6].mxu1 %vm125_vm4, %v743_v54 }
0x1092   :  { %746 = vst.msk [vmem:[#allocation2 + $0xc] sm:$0x2] %vm230_vm3, %v743_v54  ;;  %1284 = vmatpush3.bf16.msra.mxu1 %v1281_v28 }
0x1093   :  { %1286 = vmatprep.subr.bf16.mxu1 %v1285_v31 }
0x1096   :  { %1288 = vmatpush3.bf16.msra.mxu1 %v1285_v31 }
0x1164   :  { %v815_v55 = vpop.f32.mrb[6].mxu1 }
0x1165   :  { %v819_v56 = vadd.f32 %v815_v55, %v1486_v14  ;;  %v1207_v57 = vpop.f32.mrb[7].mxu1 }
0x1167   :  { %1345 = vtanh.f32 %v819_v56  ;;  %v1069_v59 = vmul.f32 -1.442695, %v819_v56 }
0x1169   :  { %1347 = vpow2.f32 %v1069_v59 }
0x1171   :  { %v1346_v58 = vpop.eup %1345 }
0x1172   :  { %829 = vrot.lane.b32.xlu0 %v1346_v58, %s1391_s20 }
0x1173   :  { %v1348_v60 = vpop.eup %1347 }
0x1174   :  { %v823_v61 = vadd.f32 1.0, %v1348_v60 }
0x1176   :  { %1349 = vrcp.f32 %v823_v61 }
0x1180   :  { %v1350_v62 = vpop.eup %1349 }
0x1181   :  { %v827_v3 = vmul.f32 %v1350_v62, %v734_v50 }
0x11e4   :  { %v830_v63 = vpop.permute.xlu0 %829 }
0x11e5   :  { %v832_v2 = vmul.f32 %v1350_v62, %v830_v63 }
0x11e7   :  { %834 = vrot.lane.b32.xlu1 %v832_v2, %s1392_s3 }
0x1259   :  { %v835_v4 = vpop.permute.xlu1 %834 }
0x125a   :  { %v837_v6 = vadd.f32 %v835_v4, %v827_v3 }
0x125c   :  { %1351 = vtanh.f32 %v837_v6 }
0x1266   :  { %v1352_v7 = vpop.eup %1351 }
0x1267   :  { %840 = vrot.lane.b32.xlu0 %v1352_v7, %s1391_s20 }
0x12d9   :  { %v841_v8 = vpop.permute.xlu0 %840 }
0x12da   :  { %v843_v9 = vmul.f32 %v1350_v62, %v841_v8 }
0x12dc   :  { %845 = vrot.lane.b32.xlu1 %v843_v9, %s1392_s3 }
0x134e   :  { %v846_v11 = vpop.permute.xlu1 %845 }
0x134f   :  { %848 = vst.msk [vmem:[#allocation2 + $0x6] sm:$0x1] %vm228_vm2, %v846_v11  ;;  %1217 = vmatmul.mubr.msk.f32.vlgmr.msra.gmra.mrb[8].mxu0 %vm125_vm4, %v846_v11 }
0x1350   :  { %849 = vst.msk [vmem:[#allocation2 + $0xd] sm:$0x2] %vm230_vm3, %v846_v11 }
0x1422   :  { %v918_v12 = vpop.f32.mrb[8].mxu0 }
0x1423   :  { %v922_v13 = vadd.f32 %v918_v12, %v1486_v14  ;;  %v1218_v15 = vpop.f32.mrb[9].mxu0 }
0x1425   :  { %1353 = vtanh.f32 %v922_v13  ;;  %v1071_v17 = vmul.f32 -1.442695, %v922_v13 }
0x1427   :  { %1355 = vpow2.f32 %v1071_v17 }
0x142f   :  { %v1354_v16 = vpop.eup %1353 }
0x1430   :  { %932 = vrot.lane.b32.xlu0 %v1354_v16, %s1391_s20 }
0x1431   :  { %v1356_v18 = vpop.eup %1355 }
0x1432   :  { %v926_v19 = vadd.f32 1.0, %v1356_v18 }
0x1434   :  { %1357 = vrcp.f32 %v926_v19 }
0x143e   :  { %v1358_v20 = vpop.eup %1357 }
0x143f   :  { %v930_v23 = vmul.f32 %v1358_v20, %v837_v6 }
0x14a2   :  { %v933_v21 = vpop.permute.xlu0 %932 }
0x14a3   :  { %v935_v22 = vmul.f32 %v1358_v20, %v933_v21 }
0x14a5   :  { %937 = vrot.lane.b32.xlu1 %v935_v22, %s1392_s3 }
0x1517   :  { %v938_v24 = vpop.permute.xlu1 %937 }
0x1518   :  { %v940_v25 = vadd.f32 %v938_v24, %v930_v23 }
0x151a   :  { %1359 = vtanh.f32 %v940_v25 }
0x1524   :  { %v1360_v14 = vpop.eup %1359 }
0x1525   :  { %943 = vrot.lane.b32.xlu0 %v1360_v14, %s1391_s20 }
0x1597   :  { %v944_v32 = vpop.permute.xlu0 %943 }
0x1598   :  { %v946_v33 = vmul.f32 %v1358_v20, %v944_v32 }
0x159a   :  { %948 = vrot.lane.b32.xlu1 %v946_v33, %s1392_s3 }
0x160c   :  { %v949_v34 = vpop.permute.xlu1 %948 }
0x160d   :  { %951 = vst.msk [vmem:[#allocation2 + $0x7] sm:$0x1] %vm228_vm2, %v949_v34 }
0x160e   :  { %952 = vst.msk [vmem:[#allocation2 + $0xe] sm:$0x2] %vm230_vm3, %v949_v34 }
0x1614   :  { %v953_v35 = vld [vmem:[#allocation2] sm:$0xff] }
0x1615   :  { %v954_v36 = vld [vmem:[#allocation2 + $0x8] sm:$0xff]  ;;  %1227 = vmatprep.mubr.msk.f32.mxu1 %vm125_vm4, %v953_v35 }
0x1616   :  { %1228 = vmatmul.mubr.msk.f32.vlgmr.msra.gmra.mrb[8].mxu1 %vm125_vm4, %v954_v36 }
0x16e9   :  { %v1229_v38 = vpop.f32.mrb[8].mxu1 }
0x16ea   :  { %v1044_v39 = vadd.f32 %v1229_v38, %v1072_v37  ;;  %v1038_v40 = vpop.f32.mrb[9].mxu1 }
0x16eb   :  { %v1039_v41 = vadd.f32 %v1072_v37, %v1038_v40 }
0x16ec   :  { %1049 = vst.msk [vmem:[%s1608_s6 + $0x8] sm:$0xff] %vm1047_vm5, %v1044_v39 }
0x16ed   :  { %1048 = vst.msk [vmem:[%s1608_s6] sm:$0xff] %vm1047_vm5, %v1039_v41 }
0x16ee   :  { %1054 = vsyncpa [#allocation4], 1 }

</bundles_post_ra>
